<compile_context>
chip_gen: v5e
topology: v5e:2x2
jax: 0.10.0
libtpu: 0.0.40
codegen_flags: <defaults>
</compile_context>

<pallas_src>
import functools

import jax
import jax.numpy as jnp
from jax.experimental import pallas as pl
from jax.experimental.pallas import tpu as pltpu


def _se_kernel(x_ref, w1t_ref, b1_ref, w2t_ref, b2_ref, o_ref, *, inv_hw):
    # x_ref block: (NB, C, HW) -- full slab, no per-image slicing / copies.
    x = x_ref[...]                                           # (NB, C, HW)
    xf = x.astype(jnp.float32)

    # Global average pool over the spatial (lane) axis: sum * (1/HW).
    pooled = jnp.sum(xf, axis=-1) * inv_hw                   # (NB, C)

    # fc1: (NB, C) @ (C, Cr) + (1, Cr) -> relu
    h = jnp.dot(pooled, w1t_ref[...],
                preferred_element_type=jnp.float32) + b1_ref[...]
    h = jnp.maximum(h, 0.0)                                  # (NB, Cr)

    # fc2: (NB, Cr) @ (Cr, C) + (1, C) -> sigmoid
    s = jnp.dot(h, w2t_ref[...],
                preferred_element_type=jnp.float32) + b2_ref[...]
    s = jax.nn.sigmoid(s)                                    # (NB, C)

    # Scale: broadcast the per-(image, channel) gate over the spatial axis.
    o_ref[...] = x * s.astype(x.dtype)[:, :, None]


def _pick_nb(B, C, HW, itemsize):
    """Largest divisor of B whose slab fits a ~4 MiB budget; keep grid >= 2."""
    slab_budget = 4 * 1024 * 1024
    bytes_per_image = max(1, C * HW * itemsize)
    nb_max = max(1, slab_budget // bytes_per_image)
    nb_cap = max(1, min(nb_max, B // 2)) if B >= 2 else 1
    nb_cap = min(nb_cap, B)
    return max(d for d in range(1, nb_cap + 1) if B % d == 0)


@jax.jit
def se_layer(x, w1, b1, w2, b2):
    """x: (B, C, H, W). Weights follow PyTorch nn.Linear conventions:
       w1: (C//r, C), b1: (C//r,), w2: (C, C//r), b2: (C,)."""
    B, C, H, W = x.shape
    HW = H * W
    Cr = w1.shape[0]
    itemsize = jnp.dtype(x.dtype).itemsize

    NB = _pick_nb(B, C, HW, itemsize)
    grid_b = B // NB

    x_flat = x.reshape(B, C, HW)
    # Pre-transpose the (tiny) weights so the kernel does row-major matmuls.
    w1t = jnp.transpose(w1).astype(jnp.float32)              # (C, Cr)
    w2t = jnp.transpose(w2).astype(jnp.float32)              # (Cr, C)
    b1_2d = b1.reshape(1, Cr).astype(jnp.float32)
    b2_2d = b2.reshape(1, C).astype(jnp.float32)

    kernel = functools.partial(_se_kernel, inv_hw=float(1.0 / HW))

    out = pl.pallas_call(
        kernel,
        out_shape=jax.ShapeDtypeStruct((B, C, HW), x.dtype),
        grid_spec=pltpu.PrefetchScalarGridSpec(
            num_scalar_prefetch=0,
            grid=(grid_b,),
            in_specs=[
                pl.BlockSpec((NB, C, HW), lambda b: (b, 0, 0)),  # x slab
                pl.BlockSpec((C, Cr), lambda b: (0, 0)),         # W1^T
                pl.BlockSpec((1, Cr), lambda b: (0, 0)),         # b1
                pl.BlockSpec((Cr, C), lambda b: (0, 0)),         # W2^T
                pl.BlockSpec((1, C), lambda b: (0, 0)),          # b2
            ],
            out_specs=pl.BlockSpec((NB, C, HW), lambda b: (b, 0, 0)),
        ),
        compiler_params=pltpu.CompilerParams(
            dimension_semantics=("parallel",),
            vmem_limit_bytes=32 * 1024 * 1024,
        ),
    )(x_flat, w1t, b1_2d, w2t, b2_2d)

    return out.reshape(B, C, H, W)


def _se_ref(x, w1, b1, w2, b2):
    # pure-JAX reference with identical semantics to the PyTorch module
    y = jnp.mean(x, axis=(2, 3))                      # (B, C)
    y = jnp.maximum(y @ w1.T + b1, 0.0)               # (B, C//r)
    y = jax.nn.sigmoid(y @ w2.T + b2)                 # (B, C)
    return x * y[:, :, None, None]


if __name__ == "__main__":
    # small, deterministic example consistent with SELayer(channel=16, reduction=8)
    B, C, H, W = 4, 16, 8, 8
    reduction = 8
    Cr = C // reduction

    key = jax.random.PRNGKey(0)
    kx, k1, k2, k3, k4 = jax.random.split(key, 5)

    x = jax.random.normal(kx, (B, C, H, W), dtype=jnp.float32)
    # deterministic synthetic parameters (shapes match nn.Linear(C, C//r) / nn.Linear(C//r, C))
    w1 = 0.1 * jax.random.normal(k1, (Cr, C), dtype=jnp.float32)
    b1 = 0.1 * jax.random.normal(k2, (Cr,), dtype=jnp.float32)
    w2 = 0.1 * jax.random.normal(k3, (C, Cr), dtype=jnp.float32)
    b2 = 0.1 * jax.random.normal(k4, (C,), dtype=jnp.float32)

    out = se_layer(x, w1, b1, w2, b2)
    out = jax.block_until_ready(out)

    ref = _se_ref(x, w1, b1, w2, b2)
    assert out.shape == (B, C, H, W)
    assert jnp.allclose(out, ref, atol=1e-5, rtol=1e-5), "mismatch vs reference"

    print("KERNEL_OK")
</pallas_src>

<mosaic_0001>
module attributes {stable_mosaic.version = 11 : i64} {
  func.func @_se_kernel(%arg0: i32, %arg1: memref<2x16x64xf32, #tpu.memory_space<vmem>>, %arg2: memref<16x2xf32, #tpu.memory_space<vmem>>, %arg3: memref<1x2xf32, #tpu.memory_space<vmem>>, %arg4: memref<2x16xf32, #tpu.memory_space<vmem>>, %arg5: memref<1x16xf32, #tpu.memory_space<vmem>>, %arg6: memref<2x16x64xf32, #tpu.memory_space<vmem>>) attributes {dimension_semantics = [#tpu.dimension_semantics<parallel>], iteration_bounds = array<i64: 2>, scalar_prefetch = 0 : i64, scratch_operands = 0 : i64, tpu.core_type = #tpu.core_type<tc>, window_params = [{transform_indices = @transform_0, window_bounds = array<i64: 2, 16, 64>}, {pipeline_mode = #tpu.pipeline_mode<synchronous>, transform_indices = @transform_1, window_bounds = array<i64: 16, 2>}, {pipeline_mode = #tpu.pipeline_mode<synchronous>, transform_indices = @transform_2, window_bounds = array<i64: 1, 2>}, {pipeline_mode = #tpu.pipeline_mode<synchronous>, transform_indices = @transform_3, window_bounds = array<i64: 2, 16>}, {pipeline_mode = #tpu.pipeline_mode<synchronous>, transform_indices = @transform_4, window_bounds = array<i64: 1, 16>}, {transform_indices = @transform_5, window_bounds = array<i64: 2, 16, 64>}]} {
    %c0 = arith.constant 0 : index
    %c0_0 = arith.constant 0 : index
    %c0_1 = arith.constant 0 : index
    %0 = vector.load %arg1[%c0, %c0_0, %c0_1] : memref<2x16x64xf32, #tpu.memory_space<vmem>>, vector<2x16x64xf32>
    %cst = arith.constant dense<0.000000e+00> : vector<2x16xf32>
    %1 = vector.multi_reduction <add>, %0, %cst [2] : vector<2x16x64xf32> to vector<2x16xf32>
    %cst_2 = arith.constant 1.562500e-02 : f32
    %2 = vector.broadcast %cst_2 : f32 to vector<2x16xf32>
    %3 = arith.mulf %1, %2 : vector<2x16xf32>
    %c0_3 = arith.constant 0 : index
    %c0_4 = arith.constant 0 : index
    %4 = vector.load %arg2[%c0_3, %c0_4] : memref<16x2xf32, #tpu.memory_space<vmem>>, vector<16x2xf32>
    %cst_5 = arith.constant dense<0.000000e+00> : vector<2x2xf32>
    %5 = tpu.matmul %3, %4, %cst_5 {dimension_numbers = #tpu.dot_dimension_numbers<[1], [0], [0], [1], [0, 0, 1, 1], [], []>} : vector<2x16xf32>, vector<16x2xf32>, vector<2x2xf32> -> vector<2x2xf32>
    %c0_6 = arith.constant 0 : index
    %c0_7 = arith.constant 0 : index
    %6 = vector.load %arg3[%c0_6, %c0_7] : memref<1x2xf32, #tpu.memory_space<vmem>>, vector<1x2xf32>
    %7 = vector.broadcast %6 : vector<1x2xf32> to vector<2x2xf32>
    %8 = arith.addf %5, %7 : vector<2x2xf32>
    %cst_8 = arith.constant 0.000000e+00 : f32
    %9 = vector.broadcast %cst_8 : f32 to vector<2x2xf32>
    %10 = arith.maximumf %8, %9 : vector<2x2xf32>
    %c0_9 = arith.constant 0 : index
    %c0_10 = arith.constant 0 : index
    %11 = vector.load %arg4[%c0_9, %c0_10] : memref<2x16xf32, #tpu.memory_space<vmem>>, vector<2x16xf32>
    %cst_11 = arith.constant dense<0.000000e+00> : vector<2x16xf32>
    %12 = tpu.matmul %10, %11, %cst_11 {dimension_numbers = #tpu.dot_dimension_numbers<[1], [0], [0], [1], [0, 0, 1, 1], [], []>} : vector<2x2xf32>, vector<2x16xf32>, vector<2x16xf32> -> vector<2x16xf32>
    %c0_12 = arith.constant 0 : index
    %c0_13 = arith.constant 0 : index
    %13 = vector.load %arg5[%c0_12, %c0_13] : memref<1x16xf32, #tpu.memory_space<vmem>>, vector<1x16xf32>
    %14 = vector.broadcast %13 : vector<1x16xf32> to vector<2x16xf32>
    %15 = arith.addf %12, %14 : vector<2x16xf32>
    %16 = arith.negf %15 : vector<2x16xf32>
    %17 = math.exp %16 : vector<2x16xf32>
    %cst_14 = arith.constant 1.000000e+00 : f32
    %18 = vector.broadcast %cst_14 : f32 to vector<2x16xf32>
    %19 = arith.addf %18, %17 : vector<2x16xf32>
    %20 = arith.divf %18, %19 : vector<2x16xf32>
    %21 = vector.shape_cast %20 : vector<2x16xf32> to vector<2x16x1xf32>
    %22 = vector.broadcast %21 : vector<2x16x1xf32> to vector<2x16x64xf32>
    %23 = arith.mulf %0, %22 : vector<2x16x64xf32>
    %c0_15 = arith.constant 0 : index
    %c0_16 = arith.constant 0 : index
    %c0_17 = arith.constant 0 : index
    %24 = vector.load %arg6[%c0_15, %c0_16, %c0_17] : memref<2x16x64xf32, #tpu.memory_space<vmem>>, vector<2x16x64xf32>
    tpu.vector_store %arg6[%c0_15, %c0_16, %c0_17], %23 {strides = array<i32>} : memref<2x16x64xf32, #tpu.memory_space<vmem>>, vector<2x16x64xf32>,
    return
  }
  func.func @transform_0(%arg0: i32) -> (i32, i32, i32) {
    %c0_i32 = arith.constant 0 : i32
    %c0_i32_0 = arith.constant 0 : i32
    %c0_i32_1 = arith.constant 0 : i32
    return %arg0, %c0_i32, %c0_i32_0 : i32, i32, i32
  }
  func.func @transform_1(%arg0: i32) -> (i32, i32) {
    %c0_i32 = arith.constant 0 : i32
    %c0_i32_0 = arith.constant 0 : i32
    %c0_i32_1 = arith.constant 0 : i32
    return %c0_i32, %c0_i32_0 : i32, i32
  }
  func.func @transform_2(%arg0: i32) -> (i32, i32) {
    %c0_i32 = arith.constant 0 : i32
    %c0_i32_0 = arith.constant 0 : i32
    %c0_i32_1 = arith.constant 0 : i32
    return %c0_i32, %c0_i32_0 : i32, i32
  }
  func.func @transform_3(%arg0: i32) -> (i32, i32) {
    %c0_i32 = arith.constant 0 : i32
    %c0_i32_0 = arith.constant 0 : i32
    %c0_i32_1 = arith.constant 0 : i32
    return %c0_i32, %c0_i32_0 : i32, i32
  }
  func.func @transform_4(%arg0: i32) -> (i32, i32) {
    %c0_i32 = arith.constant 0 : i32
    %c0_i32_0 = arith.constant 0 : i32
    %c0_i32_1 = arith.constant 0 : i32
    return %c0_i32, %c0_i32_0 : i32, i32
  }
  func.func @transform_5(%arg0: i32) -> (i32, i32, i32) {
    %c0_i32 = arith.constant 0 : i32
    %c0_i32_0 = arith.constant 0 : i32
    %c0_i32_1 = arith.constant 0 : i32
    return %arg0, %c0_i32, %c0_i32_0 : i32, i32, i32
  }
}

</mosaic_0001>

<bundles_post_ra>
// kernel: se_layer.1
= control target key start
LH: loop header
LB: loop body
LE: loop exit
PB: predicated region body
PF: predicated region fallthrough
CT: control target
= control target key end

     0   :  { %s520_s18 = smov 0   ;;  %s583_s0 = inlined_call_operand.vmem [shape: f32[4,16,64], index: 0, kind: input, shape index: {}]   ;;  %s584_s1 = inlined_call_operand.vmem [shape: f32[16,2], index: 1, kind: input, shape index: {}]   ;;  %s585_s2 = inlined_call_operand.vmem [shape: f32[1,2], index: 2, kind: input, shape index: {}]   ;;  %s586_s3 = inlined_call_operand.vmem [shape: f32[2,16], index: 3, kind: input, shape index: {}]   ;;  %s587_s4 = inlined_call_operand.vmem [shape: f32[1,16], index: 4, kind: input, shape index: {}]   ;;  %s588_s5 = inlined_call_operand.vmem [shape: f32[4,16,64], index: 5, kind: output, shape index: {}]  }
   0x1 LB: > { %s444_s19 = sadd.s32 4294967295, %s488_s18   ;;  %p448_p0 = scmp.ge.s32.totalorder %s488_s18, 1  ;;  %s488_s18 = sphi %s520_s18, %s15_s18  }
   0x2   : > { %p189_p1 = scmp.lt.s32.totalorder %s488_s18, 3 }
   0x4   : > { %p190_p2 = pnand %p448_p0, %p189_p1 }
   0x5   : > { %s449_s20 = sshll.u32 (!%p190_p2), %s444_s19, 1 }
   0x6   : > { %193 = sbr.rel (%p190_p2) target bundleno = 553 (0x229), region = 40  ;;  %p220_p3 = scmp.lt.s32.totalorder (!%p190_p2), %s449_s20, 3 }
   0xb   : > { %s590_s20 = smov (!%p220_p3, %s449_s20), 3  ;;  %vm237_vm0 = vcmask 523264   ;;  %v255_v8 = vld [vmem:[%s584_s1 + $0x8] sm:$0xff]  ;;  %v254_v9 = vld [vmem:[%s584_s1] sm:$0xff]  ;;  %v264_v12 = vlaneseq  ;;  %vm269_vm1 = vcmask 130112   ;;  %vm274_vm2 = vcmask 1041409  }
   0xc   : > { %s461_s21 = sshll.u32 %s590_s20, 4  ;;  %293 = vmatpush.msra.mxu0 %v255_v8  ;;  %vm276_vm3 = vcmask 130048   ;;  %v300_v28 = vld [vmem:[%s586_s3] sm:$0x3]  ;;  %vm309_vm4 = vcmask 1041408   ;;  %vm305_vm5 = vcmask 15360  }
   0xd   : > { %s224_s24 = scalar_lea.vmem %s583_s0, %s461_s21  ;;  %v265_v13 = vand.u32 127, %v264_v12  ;;  %456 = vmatpush.msk.msra.mxu1 %vm309_vm4, %v300_v28  ;;  %v476_v29 = vld [vmem:[%s585_s2] ss:$0 sm:$0xff]  ;;  %v354_v33 = vshrl.u32 %v264_v12, 7  ;;  %s231_s12 = scalar_lea.vmem %s588_s5, %s461_s21 }
   0xe   : > { %v536_v0 = vld [vmem:[%s224_s24 + $0x10] sm:$0xff]  ;;  %v538_v1 = vld [vmem:[%s224_s24] sm:$0xff]  ;;  %v544_v4 = vld [vmem:[%s224_s24 + $0x18] sm:$0xff]  ;;  %294 = vmatpush.msra.mxu0 %v254_v9 }
   0xf   : > { %v244_v2 = vsel %vm237_vm0, %v536_v0, 0.0  ;;  %v238_v3 = vsel %vm237_vm0, %v538_v1, 0.0  ;;  %v546_v5 = vld [vmem:[%s224_s24 + $0x8] sm:$0xff]  ;;  %v247_v6 = vsel %vm237_vm0, %v544_v4, 0.0  ;;  %v267_v16 = vadd.s32 4294967288, %v265_v13  ;;  %473 = vset.pattern.permute.xlu0 %v354_v33  ;;  %471 = vset.pattern.permute.xlu2 %v354_v33 }
  0x10   : > { %245 = vadd.xlane.f32.xlu1 %v244_v2  ;;  %239 = vadd.xlane.f32.xlu0 %v238_v3  ;;  %v241_v7 = vsel %vm237_vm0, %v546_v5, 0.0  ;;  %v361_v34 = vadd.s32 8, %v354_v33  ;;  %v477_v35 = vld [vmem:[%s587_s4] ss:$0 sm:$0xff] }
  0x12   : > { %474 = vset.pattern.permute.xlu1 %v361_v34 }
  0x18   : > { %248 = vadd.xlane.f32.xlu1 %v247_v6  ;;  %242 = vadd.xlane.f32.xlu0 %v241_v7 }
  0x83   : > { %v246_v10 = vpop.xlane.xlu1 %245  ;;  %v240_v11 = vpop.xlane.xlu0 %239 }
  0x84   : > { %v252_v14 = vmul.f32 0.015625, %v246_v10  ;;  %v250_v15 = vmul.f32 0.015625, %v240_v11 }
  0x86   : > { %v271_v21 = vperm.slane %v252_v14, %v265_v13  ;;  %v266_v22 = vperm.slane %v250_v15, %v265_v13 }
  0x8b   : > { %v249_v17 = vpop.xlane.xlu1 %248  ;;  %v243_v18 = vpop.xlane.xlu0 %242 }
  0x8c   : > { %v253_v19 = vmul.f32 0.015625, %v249_v17  ;;  %v251_v20 = vmul.f32 0.015625, %v243_v18 }
  0x8e   : > { %v272_v23 = vperm.slane %v253_v19, %v267_v16  ;;  %v268_v24 = vperm.slane %v251_v20, %v267_v16 }
  0x90   : > { %v270_v25 = vsel %vm269_vm1, %v268_v24, %v266_v22  ;;  %v273_v26 = vsel %vm269_vm1, %v272_v23, %v271_v21 }
  0x91   : > { %v275_v27 = vsel %vm274_vm2, %v273_v26, %v270_v25 }
  0x92   : > { %455 = vmatmul.msk.f32.vlgmr.msra.gmra.mxu0 %vm276_vm3, %v275_v27 }
 0x10f   : > { %v296_v30 = vpop.f32.mrf.mxu0 }
 0x110   : > { %v297_v31 = vadd.f32 %v476_v29, %v296_v30 }
 0x112   : > { %v299_v32 = vmax.f32 %v297_v31, 0.0 }
 0x114   : > { %457 = vmatmul.msk.f32.vlgmr.msra.gmra.mxu1 %vm305_vm5, %v299_v32 }
 0x191   : > { %v330_v36 = vpop.f32.mrf.mxu1 }
 0x192   : > { %v331_v37 = vadd.f32 %v477_v35, %v330_v36 }
 0x194   : > { %v458_v38 = vmul.f32 -1.442695, %v331_v37 }
 0x196   : > { %478 = vpow2.f32 %v458_v38 }
 0x19c   : > { %v479_v39 = vpop.eup %478 }
 0x19d   : > { %v336_v40 = vadd.f32 1.0, %v479_v39 }
 0x19f   : > { %480 = vrcp.f32 %v336_v40  ;;  %v348_v44 = vand.u32 2147483648, %v336_v40  ;;  %v346_v46 = vand.u32 2147483647, %v336_v40  ;;  %vm342_vm7 = vweird.f32 %v336_v40 }
 0x1a1   : > { %v349_v48 = vor.u32 1.1754944e-38, %v348_v44  ;;  %vm347_vm9 = vcmp.eq.f32.partialorder %v346_v46, 8.507059e+37 }
 0x1a5   : > { %v481_v41 = vpop.eup %480 }
 0x1a6   : > { %v338_v42 = vmul.f32 %v481_v41, %v336_v40  ;;  %vm343_vm6 = vweird.f32 %v481_v41 }
 0x1a7   : > { %vm344_vm8 = vmor %vm342_vm7, %vm343_vm6 }
 0x1a8   : > { %v339_v43 = vsub.f32 1.0, %v338_v42 }
 0x1aa   : > { %v340_v45 = vmul.f32 %v481_v41, %v339_v43 }
 0x1ac   : > { %v341_v47 = vadd.f32 %v481_v41, %v340_v45 }
 0x1ae   : > { %v345_v49 = vsel %vm344_vm8, %v481_v41, %v341_v47 }
 0x1af   : > { %v350_v50 = vsel %vm347_vm9, %v349_v48, %v345_v49 }
 0x1b0   : > { %v365_v51 = vperm.slane %v350_v50, 1  ;;  %v352_v52 = vperm.slane %v350_v50, 0 }
 0x1b2   : > { %376 = vperm.xlu1 %474, %v365_v51   ;;  %370 = vperm.xlu0 %473, %v365_v51  }
 0x1b3   : > { %357 = vperm.xlu2 %471, %v352_v52  }
 0x1ba   : > { %475 = vset.pattern.permute.xlu0 %v361_v34 }
 0x1bb   : > { %472 = vset.pattern.permute.xlu2 %v361_v34 }
 0x1c3   : > { %363 = vperm.xlu2 %472, %v352_v52  }
 0x20d   : > { %v358_v53 = vpop.permute.xlu2 %357 }
 0x20e   : > { %v378_v54 = vmul.f32 %v358_v53, %v538_v1 }
 0x210   : > { %382 = vst.msk [vmem:[%s231_s12] sm:$0xff] %vm237_vm0, %v378_v54 }
 0x21d   : > { %v364_v55 = vpop.permute.xlu2 %363 }
 0x21e   : > { %v379_v56 = vmul.f32 %v364_v55, %v546_v5 }
 0x220   : > { %383 = vst.msk [vmem:[%s231_s12 + $0x8] sm:$0xff] %vm237_vm0, %v379_v56 }
 0x224   : > { %v377_v57 = vpop.permute.xlu1 %376  ;;  %v371_v58 = vpop.permute.xlu0 %370 }
 0x225   : > { %v381_v59 = vmul.f32 %v377_v57, %v544_v4  ;;  %v380_v60 = vmul.f32 %v371_v58, %v536_v0 }
 0x227   : > { %385 = vst.msk [vmem:[%s231_s12 + $0x18] sm:$0xff] %vm237_vm0, %v381_v59 }
 0x228   : > { %384 = vst.msk [vmem:[%s231_s12 + $0x10] sm:$0xff] %vm237_vm0, %v380_v60 }
 0x229 PF: > { %s15_s18 = sadd.s32 1, %s488_s18  }
 0x22a   : > { %p12_p4 = scmp.ge.s32.totalorder %s15_s18, 4  }
 0x22c   :  { %14 = sbr.rel (!%p12_p4) target bundleno = 1 (0x1), region = 70 }

</bundles_post_ra>
